<compile_context>
chip_gen: v7x
topology: tpu7x:2x2x1
jax: 0.10.0
libtpu: 0.0.40
codegen_flags: <defaults>
</compile_context>

<pallas_src>
import functools

import jax
import jax.numpy as jnp
from jax.experimental import pallas as pl
from jax.experimental.pallas import tpu as pltpu


def _dgm_kernel(x0_ref, x1_ref, wf0_ref, wf1_ref, bf_ref, wd2_ref, bd2_ref,
                o_ref, *, conv2_on_mxu):
    wf0 = wf0_ref[...]                                  # (C4, C)
    wf1 = wf1_ref[...]                                  # (C4, C)
    bf = bf_ref[...]                                    # (C4, 1)
    wd2 = wd2_ref[...]                                  # (C4, 1) or (1, C4)
    bd2 = bd2_ref[...]                                  # (1, 1)

    nb = x0_ref.shape[0]
    for b in range(nb):                                 # static, small (<= 8)
        x0 = x0_ref[b]                                  # (C, T)
        x1 = x1_ref[b]                                  # (C, T)

        # encoder + residual + decoder conv1 + BN, all composed into two
        # (C4, C) matmuls and one per-channel bias.
        z = (jnp.dot(wf0, x0, preferred_element_type=jnp.float32)
             + jnp.dot(wf1, x1, preferred_element_type=jnp.float32)
             + bf)
        z = jnp.maximum(z, 0.0)                         # (C4, T), ReLU

        # decoder conv2 (single output channel).
        if conv2_on_mxu:
            logit = jnp.dot(wd2, z, preferred_element_type=jnp.float32) + bd2
        else:
            logit = jnp.sum(z * wd2, axis=0, keepdims=True) + bd2
        o_ref[b] = jax.nn.sigmoid(logit).astype(o_ref.dtype)   # (1, T)


@functools.partial(jax.jit, static_argnames=("tm",))
def depth_gated_forward_flat(x0, x1, params, *, tm=2048):
    """x0, x1: (N, C, S) lane-major activations (S = H*W).  Returns (N, 1, S)."""
    N, C, S = x0.shape
    f32 = jnp.float32

    # ---- fold constants (tiny (C,C)/(C4,C) ops, once per call) -------------
    eye = jnp.eye(C, dtype=f32)
    we0t = (params["we0"].astype(f32) + eye).T                  # (C, C)
    we1t = (params["we1"].astype(f32) + eye).T                  # (C, C)
    be_t = params["be"].astype(f32).T                           # (C, 1)
    wd1t = (params["wd1"].astype(f32)
            * params["bn_scale"].astype(f32)).T                 # (C4, C)
    bnb_t = params["bn_bias"].astype(f32).T                     # (C4, 1)

    wf0 = wd1t @ we0t                                           # (C4, C)
    wf1 = wd1t @ we1t                                           # (C4, C)
    bias_f = wd1t @ be_t + bnb_t                                # (C4, 1)

    C4 = wd1t.shape[0]
    conv2_on_mxu = C4 > 8
    wd2 = params["wd2"].astype(f32)                             # (C4, 1)
    wd2_k = wd2.T if conv2_on_mxu else wd2
    bd2 = params["bd2"].astype(f32)                             # (1, 1)

    # MXU operands must share a dtype; match the (big) activation dtype.
    if x0.dtype == jnp.bfloat16:
        wf0 = wf0.astype(jnp.bfloat16)
        wf1 = wf1.astype(jnp.bfloat16)

    # ---- tile / batch-block / VMEM budget ----------------------------------
    tm = max(128, int(tm))
    itemsize = jnp.dtype(x0.dtype).itemsize
    # per-lane-per-step bytes: 2 inputs x 2 (double buffer) x C, + f32 out x2.
    per_lane = 2 * 2 * C * itemsize + 2 * 4
    VMEM_BUDGET = 40 << 20                    # keep well under v7x's 64 MiB
    max_lanes = max(128, (min(tm, VMEM_BUDGET // per_lane) // 128) * 128)

    tile = min(pl.cdiv(S, 128) * 128, max_lanes)      # lane-dense spatial tile
    nb = int(max(1, min(N, max_lanes // tile, 8)))    # pack batches if S small

    grid = (pl.cdiv(N, nb), pl.cdiv(S, tile))         # ragged edges: no pad
    vmem_limit = int(min(48 << 20,
                         max(32 << 20, per_lane * tile * nb + (2 << 20))))

    x_spec = pl.BlockSpec((nb, C, tile), lambda b, i: (b, 0, i))
    wspec = lambda a: pl.BlockSpec(a.shape, lambda b, i: (0, 0))

    out = pl.pallas_call(
        functools.partial(_dgm_kernel, conv2_on_mxu=conv2_on_mxu),
        out_shape=jax.ShapeDtypeStruct((N, 1, S), jnp.float32),
        grid_spec=pltpu.PrefetchScalarGridSpec(
            num_scalar_prefetch=0,
            grid=grid,
            in_specs=[
                x_spec,            # x0  (nb, C, tile)
                x_spec,            # x1  (nb, C, tile)
                wspec(wf0),        # composed weight for x0     (C4, C)
                wspec(wf1),        # composed weight for x1     (C4, C)
                wspec(bias_f),     # composed bias (BN folded)  (C4, 1)
                wspec(wd2_k),      # conv2 weight
                wspec(bd2),        # conv2 bias                 (1, 1)
            ],
            out_specs=pl.BlockSpec((nb, 1, tile), lambda b, i: (b, 0, i)),
        ),
        compiler_params=pltpu.CompilerParams(
            dimension_semantics=("parallel", "parallel"),
            vmem_limit_bytes=vmem_limit),
    )(x0, x1, wf0, wf1, bias_f, wd2_k, bd2)

    return out


@functools.partial(jax.jit, static_argnames=("tm",))
def depth_gated_forward(d0, d1, params, *, tm=2048):
    """NCHW convenience wrapper: d0, d1 (N, C, H, W) -> (N, 1, H, W).

    NOTE: the (H,W)->(H*W) flatten below may lower to an HBM relayout copy
    under TPU (8,128) tiled layouts.  For peak bandwidth, produce lane-major
    (N, C, H*W) activations upstream and call depth_gated_forward_flat.
    """
    N, C, H, W = d0.shape
    y = depth_gated_forward_flat(d0.reshape(N, C, H * W),
                                 d1.reshape(N, C, H * W), params, tm=tm)
    return y.reshape(N, 1, H, W)


def init_params(key, inplanes):
    """Deterministic synthetic parameters matching the PyTorch module shapes."""
    C = inplanes
    C4 = inplanes // 4
    ks = jax.random.split(key, 6)

    # encoder: Conv2d(2C, C, 1).  PyTorch weight (C, 2C, 1, 1) -> matmul (2C, C)
    w_enc = jax.random.normal(ks[0], (2 * C, C), jnp.float32) * 0.05
    b_enc = jax.random.normal(ks[1], (1, C), jnp.float32) * 0.05

    # decoder conv1: Conv2d(C, C//4, 1) -> matmul (C, C4)
    w_d1 = jax.random.normal(ks[2], (C, C4), jnp.float32) * 0.05
    b_d1 = jax.random.normal(ks[3], (1, C4), jnp.float32) * 0.05

    # BatchNorm2d(C4) default init / running stats (inference mode)
    gamma = jnp.ones((1, C4), jnp.float32)
    beta = jnp.zeros((1, C4), jnp.float32)
    run_mean = jnp.zeros((1, C4), jnp.float32)
    run_var = jnp.ones((1, C4), jnp.float32)
    eps = 1e-5
    bn_scale = gamma / jnp.sqrt(run_var + eps)
    bn_bias = beta + bn_scale * (b_d1 - run_mean)      # conv1 bias folded in

    # decoder conv2: Conv2d(C4, 1, 1) -> matmul (C4, 1)
    w_d2 = jax.random.normal(ks[4], (C4, 1), jnp.float32) * 0.05
    b_d2 = jax.random.normal(ks[5], (1, 1), jnp.float32) * 0.05

    return {
        "we0": w_enc[:C], "we1": w_enc[C:], "be": b_enc,
        "wd1": w_d1, "bn_scale": bn_scale, "bn_bias": bn_bias,
        "wd2": w_d2, "bd2": b_d2,
    }


def reference_forward(d0, d1, params):
    """Pure-JAX reference (unfused, unfolded math, NCHW in/out)."""
    N, C, H, W = d0.shape
    x0 = jnp.transpose(d0, (0, 2, 3, 1)).reshape(-1, C)
    x1 = jnp.transpose(d1, (0, 2, 3, 1)).reshape(-1, C)
    d = x0 @ params["we0"] + x1 @ params["we1"] + params["be"]
    h = d + x0 + x1
    z = jnp.maximum(h @ params["wd1"] * params["bn_scale"] + params["bn_bias"], 0.0)
    y = jax.nn.sigmoid(z @ params["wd2"] + params["bd2"])
    return jnp.transpose(y.reshape(N, H, W, 1), (0, 3, 1, 2))


if __name__ == "__main__":
    key = jax.random.PRNGKey(0)
    k0, k1, kp = jax.random.split(key, 3)

    inplanes = 16
    N, H, W = 2, 16, 16

    d0 = jax.random.normal(k0, (N, inplanes, H, W), jnp.float32)
    d1 = jax.random.normal(k1, (N, inplanes, H, W), jnp.float32)
    params = init_params(kp, inplanes)

    y = depth_gated_forward(d0, d1, params)
    jax.block_until_ready(y)

    y_ref = reference_forward(d0, d1, params)
    assert y.shape == (N, 1, H, W), y.shape
    assert jnp.allclose(y, y_ref, atol=1e-5, rtol=1e-5), "mismatch vs reference"

    print("KERNEL_OK")
</pallas_src>

<mosaic_0001>
module attributes {stable_mosaic.version = 11 : i64} {
  func.func @_dgm_kernel(%arg0: i32, %arg1: i32, %arg2: memref<2x16x256xf32, #tpu.memory_space<vmem>>, %arg3: memref<2x16x256xf32, #tpu.memory_space<vmem>>, %arg4: memref<4x16xf32, #tpu.memory_space<vmem>>, %arg5: memref<4x16xf32, #tpu.memory_space<vmem>>, %arg6: memref<4x1xf32, #tpu.memory_space<vmem>>, %arg7: memref<4x1xf32, #tpu.memory_space<vmem>>, %arg8: memref<1x1xf32, #tpu.memory_space<vmem>>, %arg9: memref<2x1x256xf32, #tpu.memory_space<vmem>>) attributes {dimension_semantics = [#tpu.dimension_semantics<parallel>, #tpu.dimension_semantics<parallel>], iteration_bounds = array<i64: 1, 1>, scalar_prefetch = 0 : i64, scratch_operands = 0 : i64, tpu.core_type = #tpu.core_type<tc>, window_params = [{transform_indices = @transform_0, window_bounds = array<i64: 2, 16, 256>}, {transform_indices = @transform_1, window_bounds = array<i64: 2, 16, 256>}, {pipeline_mode = #tpu.pipeline_mode<synchronous>, transform_indices = @transform_2, window_bounds = array<i64: 4, 16>}, {pipeline_mode = #tpu.pipeline_mode<synchronous>, transform_indices = @transform_3, window_bounds = array<i64: 4, 16>}, {pipeline_mode = #tpu.pipeline_mode<synchronous>, transform_indices = @transform_4, window_bounds = array<i64: 4, 1>}, {pipeline_mode = #tpu.pipeline_mode<synchronous>, transform_indices = @transform_5, window_bounds = array<i64: 4, 1>}, {pipeline_mode = #tpu.pipeline_mode<synchronous>, transform_indices = @transform_6, window_bounds = array<i64: 1, 1>}, {transform_indices = @transform_7, window_bounds = array<i64: 2, 1, 256>}]} {
    %c0 = arith.constant 0 : index
    %c0_0 = arith.constant 0 : index
    %0 = vector.load %arg4[%c0, %c0_0] : memref<4x16xf32, #tpu.memory_space<vmem>>, vector<4x16xf32>
    %c0_1 = arith.constant 0 : index
    %c0_2 = arith.constant 0 : index
    %1 = vector.load %arg5[%c0_1, %c0_2] : memref<4x16xf32, #tpu.memory_space<vmem>>, vector<4x16xf32>
    %c0_3 = arith.constant 0 : index
    %c0_4 = arith.constant 0 : index
    %2 = vector.load %arg6[%c0_3, %c0_4] : memref<4x1xf32, #tpu.memory_space<vmem>>, vector<4x1xf32>
    %c0_5 = arith.constant 0 : index
    %c0_6 = arith.constant 0 : index
    %3 = vector.load %arg7[%c0_5, %c0_6] : memref<4x1xf32, #tpu.memory_space<vmem>>, vector<4x1xf32>
    %c0_7 = arith.constant 0 : index
    %c0_8 = arith.constant 0 : index
    %4 = vector.load %arg8[%c0_7, %c0_8] : memref<1x1xf32, #tpu.memory_space<vmem>>, vector<1x1xf32>
    %c0_9 = arith.constant 0 : index
    %c0_10 = arith.constant 0 : index
    %c0_11 = arith.constant 0 : index
    %5 = vector.load %arg2[%c0_9, %c0_10, %c0_11] : memref<2x16x256xf32, #tpu.memory_space<vmem>>, vector<1x16x256xf32>
    %6 = vector.shape_cast %5 : vector<1x16x256xf32> to vector<16x256xf32>
    %c0_12 = arith.constant 0 : index
    %c0_13 = arith.constant 0 : index
    %c0_14 = arith.constant 0 : index
    %7 = vector.load %arg3[%c0_12, %c0_13, %c0_14] : memref<2x16x256xf32, #tpu.memory_space<vmem>>, vector<1x16x256xf32>
    %8 = vector.shape_cast %7 : vector<1x16x256xf32> to vector<16x256xf32>
    %cst = arith.constant dense<0.000000e+00> : vector<4x256xf32>
    %9 = tpu.matmul %0, %6, %cst {dimension_numbers = #tpu.dot_dimension_numbers<[1], [0], [0], [1], [0, 0, 1, 1], [], []>} : vector<4x16xf32>, vector<16x256xf32>, vector<4x256xf32> -> vector<4x256xf32>
    %cst_15 = arith.constant dense<0.000000e+00> : vector<4x256xf32>
    %10 = tpu.matmul %1, %8, %cst_15 {dimension_numbers = #tpu.dot_dimension_numbers<[1], [0], [0], [1], [0, 0, 1, 1], [], []>} : vector<4x16xf32>, vector<16x256xf32>, vector<4x256xf32> -> vector<4x256xf32>
    %11 = arith.addf %9, %10 : vector<4x256xf32>
    %12 = vector.broadcast %2 : vector<4x1xf32> to vector<4x256xf32>
    %13 = arith.addf %11, %12 : vector<4x256xf32>
    %cst_16 = arith.constant 0.000000e+00 : f32
    %14 = vector.broadcast %cst_16 : f32 to vector<4x256xf32>
    %15 = arith.maximumf %13, %14 : vector<4x256xf32>
    %16 = vector.broadcast %3 : vector<4x1xf32> to vector<4x256xf32>
    %17 = arith.mulf %15, %16 : vector<4x256xf32>
    %cst_17 = arith.constant dense<0.000000e+00> : vector<256xf32>
    %18 = vector.multi_reduction <add>, %17, %cst_17 [0] : vector<4x256xf32> to vector<256xf32>
    %19 = vector.shape_cast %18 : vector<256xf32> to vector<1x256xf32>
    %20 = vector.broadcast %4 : vector<1x1xf32> to vector<1x256xf32>
    %21 = arith.addf %19, %20 : vector<1x256xf32>
    %22 = arith.negf %21 : vector<1x256xf32>
    %23 = math.exp %22 : vector<1x256xf32>
    %cst_18 = arith.constant 1.000000e+00 : f32
    %24 = vector.broadcast %cst_18 : f32 to vector<1x256xf32>
    %25 = arith.addf %24, %23 : vector<1x256xf32>
    %26 = arith.divf %24, %25 : vector<1x256xf32>
    %c0_19 = arith.constant 0 : index
    %c0_20 = arith.constant 0 : index
    %c0_21 = arith.constant 0 : index
    %27 = vector.load %arg9[%c0_19, %c0_20, %c0_21] : memref<2x1x256xf32, #tpu.memory_space<vmem>>, vector<1x1x256xf32>
    %28 = vector.shape_cast %27 : vector<1x1x256xf32> to vector<1x256xf32>
    %29 = vector.shape_cast %26 : vector<1x256xf32> to vector<1x1x256xf32>
    tpu.vector_store %arg9[%c0_19, %c0_20, %c0_21], %29 {strides = array<i32>} : memref<2x1x256xf32, #tpu.memory_space<vmem>>, vector<1x1x256xf32>,
    %c1 = arith.constant 1 : index
    %c0_22 = arith.constant 0 : index
    %c0_23 = arith.constant 0 : index
    %30 = vector.load %arg2[%c1, %c0_22, %c0_23] : memref<2x16x256xf32, #tpu.memory_space<vmem>>, vector<1x16x256xf32>
    %31 = vector.shape_cast %30 : vector<1x16x256xf32> to vector<16x256xf32>
    %c1_24 = arith.constant 1 : index
    %c0_25 = arith.constant 0 : index
    %c0_26 = arith.constant 0 : index
    %32 = vector.load %arg3[%c1_24, %c0_25, %c0_26] : memref<2x16x256xf32, #tpu.memory_space<vmem>>, vector<1x16x256xf32>
    %33 = vector.shape_cast %32 : vector<1x16x256xf32> to vector<16x256xf32>
    %cst_27 = arith.constant dense<0.000000e+00> : vector<4x256xf32>
    %34 = tpu.matmul %0, %31, %cst_27 {dimension_numbers = #tpu.dot_dimension_numbers<[1], [0], [0], [1], [0, 0, 1, 1], [], []>} : vector<4x16xf32>, vector<16x256xf32>, vector<4x256xf32> -> vector<4x256xf32>
    %cst_28 = arith.constant dense<0.000000e+00> : vector<4x256xf32>
    %35 = tpu.matmul %1, %33, %cst_28 {dimension_numbers = #tpu.dot_dimension_numbers<[1], [0], [0], [1], [0, 0, 1, 1], [], []>} : vector<4x16xf32>, vector<16x256xf32>, vector<4x256xf32> -> vector<4x256xf32>
    %36 = arith.addf %34, %35 : vector<4x256xf32>
    %37 = vector.broadcast %2 : vector<4x1xf32> to vector<4x256xf32>
    %38 = arith.addf %36, %37 : vector<4x256xf32>
    %cst_29 = arith.constant 0.000000e+00 : f32
    %39 = vector.broadcast %cst_29 : f32 to vector<4x256xf32>
    %40 = arith.maximumf %38, %39 : vector<4x256xf32>
    %41 = vector.broadcast %3 : vector<4x1xf32> to vector<4x256xf32>
    %42 = arith.mulf %40, %41 : vector<4x256xf32>
    %cst_30 = arith.constant dense<0.000000e+00> : vector<256xf32>
    %43 = vector.multi_reduction <add>, %42, %cst_30 [0] : vector<4x256xf32> to vector<256xf32>
    %44 = vector.shape_cast %43 : vector<256xf32> to vector<1x256xf32>
    %45 = vector.broadcast %4 : vector<1x1xf32> to vector<1x256xf32>
    %46 = arith.addf %44, %45 : vector<1x256xf32>
    %47 = arith.negf %46 : vector<1x256xf32>
    %48 = math.exp %47 : vector<1x256xf32>
    %cst_31 = arith.constant 1.000000e+00 : f32
    %49 = vector.broadcast %cst_31 : f32 to vector<1x256xf32>
    %50 = arith.addf %49, %48 : vector<1x256xf32>
    %51 = arith.divf %49, %50 : vector<1x256xf32>
    %c1_32 = arith.constant 1 : index
    %c0_33 = arith.constant 0 : index
    %c0_34 = arith.constant 0 : index
    %52 = vector.load %arg9[%c1_32, %c0_33, %c0_34] : memref<2x1x256xf32, #tpu.memory_space<vmem>>, vector<1x1x256xf32>
    %53 = vector.shape_cast %52 : vector<1x1x256xf32> to vector<1x256xf32>
    %54 = vector.shape_cast %51 : vector<1x256xf32> to vector<1x1x256xf32>
    tpu.vector_store %arg9[%c1_32, %c0_33, %c0_34], %54 {strides = array<i32>} : memref<2x1x256xf32, #tpu.memory_space<vmem>>, vector<1x1x256xf32>,
    return
  }
  func.func @transform_0(%arg0: i32, %arg1: i32) -> (i32, i32, i32) {
    %c0_i32 = arith.constant 0 : i32
    %c0_i32_0 = arith.constant 0 : i32
    return %arg0, %c0_i32, %arg1 : i32, i32, i32
  }
  func.func @transform_1(%arg0: i32, %arg1: i32) -> (i32, i32, i32) {
    %c0_i32 = arith.constant 0 : i32
    %c0_i32_0 = arith.constant 0 : i32
    return %arg0, %c0_i32, %arg1 : i32, i32, i32
  }
  func.func @transform_2(%arg0: i32, %arg1: i32) -> (i32, i32) {
    %c0_i32 = arith.constant 0 : i32
    %c0_i32_0 = arith.constant 0 : i32
    %c0_i32_1 = arith.constant 0 : i32
    return %c0_i32, %c0_i32_0 : i32, i32
  }
  func.func @transform_3(%arg0: i32, %arg1: i32) -> (i32, i32) {
    %c0_i32 = arith.constant 0 : i32
    %c0_i32_0 = arith.constant 0 : i32
    %c0_i32_1 = arith.constant 0 : i32
    return %c0_i32, %c0_i32_0 : i32, i32
  }
  func.func @transform_4(%arg0: i32, %arg1: i32) -> (i32, i32) {
    %c0_i32 = arith.constant 0 : i32
    %c0_i32_0 = arith.constant 0 : i32
    %c0_i32_1 = arith.constant 0 : i32
    return %c0_i32, %c0_i32_0 : i32, i32
  }
  func.func @transform_5(%arg0: i32, %arg1: i32) -> (i32, i32) {
    %c0_i32 = arith.constant 0 : i32
    %c0_i32_0 = arith.constant 0 : i32
    %c0_i32_1 = arith.constant 0 : i32
    return %c0_i32, %c0_i32_0 : i32, i32
  }
  func.func @transform_6(%arg0: i32, %arg1: i32) -> (i32, i32) {
    %c0_i32 = arith.constant 0 : i32
    %c0_i32_0 = arith.constant 0 : i32
    %c0_i32_1 = arith.constant 0 : i32
    return %c0_i32, %c0_i32_0 : i32, i32
  }
  func.func @transform_7(%arg0: i32, %arg1: i32) -> (i32, i32, i32) {
    %c0_i32 = arith.constant 0 : i32
    %c0_i32_0 = arith.constant 0 : i32
    return %arg0, %c0_i32, %arg1 : i32, i32, i32
  }
}

</mosaic_0001>

<bundles_post_ra>
// kernel: depth_gated_forward_flat.1
= control target key start
LH: loop header
LB: loop body
LE: loop exit
PB: predicated region body
PF: predicated region fallthrough
CT: control target
= control target key end

     0   :  { %s701_s0 = inlined_call_operand.vmem [shape: f32[2,16,256], index: 0, kind: input, shape index: {}]   ;;  %s702_s1 = inlined_call_operand.vmem [shape: f32[2,16,256], index: 1, kind: input, shape index: {}]   ;;  %s703_s2 = inlined_call_operand.vmem [shape: f32[4,16], index: 2, kind: input, shape index: {}]   ;;  %s704_s3 = inlined_call_operand.vmem [shape: f32[4,16], index: 3, kind: input, shape index: {}]   ;;  %s705_s4 = inlined_call_operand.vmem [shape: f32[4,1], index: 4, kind: input, shape index: {}]   ;;  %s706_s5 = inlined_call_operand.vmem [shape: f32[4,1], index: 5, kind: input, shape index: {}]   ;;  %s707_s6 = inlined_call_operand.<no memory space> [shape: f32[1,1], index: 6, kind: input, shape index: {}]   ;;  %s708_s7 = inlined_call_operand.hbm [shape: f32[2,1,256], index: 7, kind: output, shape index: {}]  }
   0x1   :  { %v12_v0 = vstv %s707_s6 }
   0x2   :  { %13 = vst [vmem:[#allocation2] sm:$0x1] %v12_v0 }
   0x3   :  { %v39_v1 = vld [vmem:[%s702_s1 + $0x8] sm:$0xff]  ;;  %v41_v2 = vld [vmem:[%s702_s1 + $0x18] sm:$0xff]  ;;  %v38_v6 = vld [vmem:[%s702_s1] sm:$0xff]  ;;  %v574_v8 = vmov 0.0   ;;  %v575_v14 = vmov 0   ;;  %vm42_vm0 = vcmask 130048  }
   0x4   :  { %v499_v3 = vld [vmem:[%s702_s1 + $0x28] sm:$0xff]  ;;  %v506_v4 = vpack.c.bf16 %v41_v2, %v39_v1  ;;  %v501_v5 = vld [vmem:[%s702_s1 + $0x38] sm:$0xff]  ;;  %v40_v7 = vld [vmem:[%s702_s1 + $0x10] sm:$0xff]  ;;  %110 = vmatprep.mubr.f32.mxu0 %v574_v8  ;;  %342 = vmatprep.mubr.f32.mxu1 %v574_v8 }
   0x5   :  { %v514_v9 = vpack.c.bf16 %v501_v5, %v499_v3  ;;  %v508_v10 = vpack.c.bf16 %v40_v7, %v38_v6  ;;  %v498_v11 = vld [vmem:[%s702_s1 + $0x20] sm:$0xff]  ;;  %v500_v12 = vld [vmem:[%s702_s1 + $0x30] sm:$0xff]  ;;  %532 = vset.pattern.permute.xlu0 %v575_v14  ;;  %533 = vset.pattern.permute.xlu1 %v575_v14  ;;  %v35_v16 = vld [vmem:[%s701_s0 + $0x8] sm:$0xff] }
   0x6   :  { %v30_v13 = vld [vmem:[%s704_s3] sm:$0xf]  ;;  %507 = vmatprep.subr.bf16.mxu0 %v506_v4  ;;  %v516_v15 = vpack.c.bf16 %v500_v12, %v498_v11  ;;  %v37_v17 = vld [vmem:[%s701_s0 + $0x18] sm:$0xff]  ;;  %v495_v18 = vld [vmem:[%s701_s0 + $0x28] sm:$0xff] }
   0x7   :  { %515 = vmatprep.subr.bf16.mxu1 %v514_v9  ;;  %509 = vmatpush1.bf16.msra.mxu0 %v508_v10  ;;  %v510_v19 = vpack.c.bf16 %v37_v17, %v35_v16  ;;  %v497_v20 = vld [vmem:[%s701_s0 + $0x38] sm:$0xff]  ;;  %v34_v21 = vld [vmem:[%s701_s0] sm:$0xff]  ;;  %v36_v22 = vld [vmem:[%s701_s0 + $0x10] sm:$0xff] }
   0x8   :  { %517 = vmatpush1.bf16.msra.mxu1 %v516_v15  ;;  %v518_v23 = vpack.c.bf16 %v497_v20, %v495_v18  ;;  %v512_v24 = vpack.c.bf16 %v36_v22, %v34_v21  ;;  %v494_v25 = vld [vmem:[%s701_s0 + $0x20] sm:$0xff]  ;;  %v496_v26 = vld [vmem:[%s701_s0 + $0x30] sm:$0xff] }
   0x9   :  { %511 = vmatprep.subr.bf16.mxu0 %v510_v19  ;;  %v520_v27 = vpack.c.bf16 %v496_v26, %v494_v25  ;;  %v31_v28 = vld [vmem:[%s705_s4] sm:$0xf] }
   0xa   :  { %490 = vmatmul.mubr.msk.f32.vlgmr.msra.gmra.mrb[0].mxu0 %vm42_vm0, %v30_v13  ;;  %519 = vmatprep.subr.bf16.mxu1 %v518_v23 }
   0xb   :  { %14 = vsyncpa [#allocation4], 0  ;;  %502 = vmatmul.mubr.msk.f32.vlgmr.msra.gmra.mrb[0].mxu1 %vm42_vm0, %v30_v13  ;;  %513 = vmatpush1.bf16.msra.mxu0 %v512_v24  ;;  %v33_v29 = vld [vmem:[#allocation2] sm:$0x1]  ;;  %vm207_vm1 = vcmask 1043456   ;;  %v227_v45 = vlaneseq }
   0xc   :  { %521 = vmatpush1.bf16.msra.mxu1 %v520_v27  ;;  %184 = vmatprep.mubr.f32.mxu0 %v574_v8  ;;  %v32_v30 = vld [vmem:[%s706_s5] sm:$0xf] }
   0xd   :  { %413 = vmatprep.mubr.f32.mxu1 %v574_v8  ;;  %193 = vperm.xlu0 %532, %v31_v28   ;;  %v29_v31 = vld [vmem:[%s703_s2] sm:$0xf]  ;;  %v228_v55 = vshrl.u32 %v227_v45, 7  ;;  %s577_s2 = smov [#allocation3]   ;;  %vm265_vm2 = vcmp.lt.s32.totalorder %v227_v45, 256 }
   0xe   :  { %224 = vperm.xlu1 %533, %v33_v29   ;;  %s479_s4 = sshll.u32 %s577_s2, 4  ;;  %s480_s4 = int_to_ptr.vmem [resolvable:$true] %s479_s4 }
   0xf   :  { %v229_v1 = vsub.s32 0, %v228_v55  ;;  %s550_s5 = scalar_lea.vmem %s480_s4, 64  ;;  %p555_p1 = scmp.lt.s32.totalorder %s480_s4, %s480_s4 }
  0x10   :  { %p551_p0 = scmp.ne.s32.totalorder %s480_s4, %s550_s5  ;;  %p556_p2 = scmp.lt.s32.totalorder %s550_s5, %s550_s5 }
  0x11   :  { %202 = vperm.xlu0 %532, %v32_v30  }
  0x12   :  { %491 = vmatmul.mubr.msk.f32.vlgmr.msra.gmra.mrb[0].mxu0 %vm42_vm0, %v29_v31  ;;  %p557_p3 = por %p556_p2, %p555_p1 }
  0x13   :  { %503 = vmatmul.mubr.msk.f32.vlgmr.msra.gmra.mrb[0].mxu1 %vm42_vm0, %v29_v31 }
  0x14   :  { %p558_p4 = pnand %p557_p3, %p551_p0 }
  0x8c   :  { %v194_v32 = vpop.permute.xlu0 %193 }
  0x8d   :  { %v225_v4 = vpop.permute.xlu1 %224 }
  0x8e   :  { %v230_v11 = vrot.slane %v225_v4, %v229_v1 }
  0x90   :  { %v203_v44 = vpop.permute.xlu0 %202 }
  0xe5   :  { %v186_v33 = vpop.f32.mrb[0].mxu0 }
  0xe6   :  { %v196_v34 = vadd.f32 %v194_v32, %v186_v33  ;;  %v415_v35 = vpop.f32.mrb[0].mxu1  ;;  %v188_v36 = vpop.f32.mrb[1].mxu0 }
  0xe7   :  { %v420_v37 = vadd.f32 %v415_v35, %v194_v32  ;;  %v197_v38 = vadd.f32 %v194_v32, %v188_v36  ;;  %v417_v39 = vpop.f32.mrb[1].mxu1  ;;  %v576_v35 = vmov 1966171168  }
  0xe8   :  { %v198_v40 = vmax.f32 %v196_v34, 0.0  ;;  %v421_v41 = vadd.f32 %v417_v39, %v194_v32  ;;  %v249_v36 = vunpack.c.l.s4 %v576_v35 }
  0xe9   :  { %v422_v42 = vmax.f32 %v420_v37, 0.0  ;;  %v199_v43 = vmax.f32 %v197_v38, 0.0 }
  0xea   :  { %v423_v46 = vmax.f32 %v421_v41, 0.0  ;;  %v205_v47 = vmul.f32 %v203_v44, %v198_v40  ;;  %v250_v37 = vunpack.c.0.s8 %v249_v36 }
  0xeb   :  { %v206_v48 = vmul.f32 %v203_v44, %v199_v43  ;;  %v424_v49 = vmul.f32 %v422_v42, %v203_v44 }
  0xec   :  { %v208_v50 = vsel %vm207_vm1, %v205_v47, 0.0  ;;  %v425_v51 = vmul.f32 %v423_v46, %v203_v44  ;;  %v253_v39 = vsub.s32 %v250_v37, %v228_v55 }
  0xed   :  { %v209_v52 = vrot.slane %v208_v50, 4  ;;  %v215_v53 = vsel %vm207_vm1, %v206_v48, 0.0  ;;  %v426_v54 = vsel %vm207_vm1, %v424_v49, 0.0 }
  0xee   :  { %v216_v56 = vrot.slane %v215_v53, 4  ;;  %v427_v57 = vrot.slane %v426_v54, 4  ;;  %v433_v58 = vsel %vm207_vm1, %v425_v51, 0.0 }
  0xef   :  { %v210_v59 = vadd.f32 %v209_v52, %v208_v50  ;;  %v434_v60 = vrot.slane %v433_v58, 4 }
  0xf0   :  { %v217_v61 = vadd.f32 %v216_v56, %v215_v53  ;;  %v428_v62 = vadd.f32 %v427_v57, %v426_v54 }
  0xf1   :  { %v211_v63 = vrot.slane %v210_v59, 2  ;;  %v435_v0 = vadd.f32 %v434_v60, %v433_v58 }
  0xf2   :  { %v218_v2 = vrot.slane %v217_v61, 2  ;;  %v429_v3 = vrot.slane %v428_v62, 2 }
  0xf3   :  { %v212_v5 = vadd.f32 %v211_v63, %v210_v59  ;;  %v436_v6 = vrot.slane %v435_v0, 2 }
  0xf4   :  { %v219_v7 = vadd.f32 %v218_v2, %v217_v61  ;;  %v430_v8 = vadd.f32 %v429_v3, %v428_v62 }
  0xf5   :  { %v213_v9 = vrot.slane %v212_v5, 1  ;;  %v437_v10 = vadd.f32 %v436_v6, %v435_v0 }
  0xf6   :  { %v220_v12 = vrot.slane %v219_v7, 1  ;;  %v431_v13 = vrot.slane %v430_v8, 1 }
  0xf7   :  { %v438_v14 = vrot.slane %v437_v10, 1  ;;  %v214_v15 = vadd.f32 %v213_v9, %v212_v5 }
  0xf8   :  { %v221_v16 = vadd.f32 %v220_v12, %v219_v7  ;;  %v432_v17 = vadd.f32 %v431_v13, %v430_v8 }
  0xf9   :  { %v231_v18 = vadd.f32 %v230_v11, %v214_v15  ;;  %v439_v19 = vadd.f32 %v438_v14, %v437_v10 }
  0xfa   :  { %v232_v20 = vadd.f32 %v230_v11, %v221_v16  ;;  %v440_v21 = vadd.f32 %v432_v17, %v230_v11 }
  0xfb   :  { %v492_v22 = vmul.f32 -1.442695, %v231_v18  ;;  %v441_v23 = vadd.f32 %v439_v19, %v230_v11 }
  0xfc   :  { %v493_v24 = vmul.f32 -1.442695, %v232_v20  ;;  %v504_v25 = vmul.f32 -1.442695, %v440_v21 }
  0xfd   :  { %534 = vpow2.f32 %v492_v22  ;;  %v505_v26 = vmul.f32 -1.442695, %v441_v23 }
  0xfe   :  { %536 = vpow2.f32 %v493_v24 }
  0xff   :  { %538 = vpow2.f32 %v504_v25 }
 0x100   :  { %540 = vpow2.f32 %v505_v26 }
 0x107   :  { %v535_v27 = vpop.eup %534 }
 0x108   :  { %v537_v28 = vpop.eup %536  ;;  %v239_v29 = vadd.f32 1.0, %v535_v27 }
 0x109   :  { %v539_v30 = vpop.eup %538  ;;  %v240_v31 = vadd.f32 1.0, %v537_v28 }
 0x10a   :  { %v541_v32 = vpop.eup %540  ;;  %542 = vrcp.f32 %v239_v29  ;;  %v448_v33 = vadd.f32 1.0, %v539_v30 }
 0x10b   :  { %544 = vrcp.f32 %v240_v31  ;;  %v449_v34 = vadd.f32 1.0, %v541_v32 }
 0x10c   :  { %546 = vrcp.f32 %v448_v33 }
 0x10d   :  { %548 = vrcp.f32 %v449_v34 }
 0x114   :  { %v543_v38 = vpop.eup %542 }
 0x115   :  { %v545_v40 = vpop.eup %544 }
 0x116   :  { %v547_v41 = vpop.eup %546  ;;  %v247_v42 = vcombine.low %v543_v38, %v545_v40 }
 0x117   :  { %v549_v43 = vpop.eup %548 }
 0x118   :  { %v254_v44 = vrot.slane %v247_v42, %v253_v39  ;;  %v456_v46 = vcombine.low %v547_v41, %v549_v43 }
 0x11a   :  { %v261_v47 = vrot.slane %v254_v44, %v253_v39  ;;  %v463_v48 = vrot.slane %v456_v46, %v253_v39 }
 0x11c   :  { %267 = vst.msk [vmem:[#allocation3] sm:$0x3] %vm265_vm2, %v261_v47  ;;  %v470_v49 = vrot.slane %v463_v48, %v253_v39 }
 0x11e   :  { %473 = vst.msk [vmem:[#allocation3 + $0x2] sm:$0x3] %vm265_vm2, %v470_v49 }
 0x11f   :  { %561 = shalt.err (!%p558_p4)
}
 0x120   :  { %s562_s17 = scalar_lea.hbm %s708_s7, 64 }
 0x121   :  { %p563_p5 = scmp.ne.s32.totalorder %s708_s7, %s562_s17  ;;  %p566_p6 = scmp.lt.u32.totalorder %s562_s17, %s708_s7 }
 0x123   :  { %p568_p7 = pnand %p566_p6, %p563_p5 }
 0x125   :  { %571 = shalt.err (!%p568_p7)
}
 0x126   :  { %s578_s22 = smov 32   ;;  %s579_s23 = smov 2  }
 0x127   :  { %485 = dma.vmem_to_hbm [thread:$0]  %s480_s4, 64, %s708_s7, [#allocation4], %s578_s22, %s578_s22, %s579_s23  }
 0x128   :  { %572 = dma.done.wait [#allocation4], 64  }
 0x129   :  { %573 = vsyncadd [#allocation4], 4294967232 }
 0x12a   :  { %489 = vsyncpa [#allocation4], 1 }

</bundles_post_ra>
